<compile_context>
chip_gen: v7x
topology: tpu7x:2x2x1
jax: 0.10.0
libtpu: 0.0.40
codegen_flags: <defaults>
</compile_context>

<pallas_src>
import functools

import jax
import jax.numpy as jnp
from jax import lax
from jax.experimental import pallas as pl
from jax.experimental.pallas import tpu as pltpu


def _round_up(x, m):
    return (x + m - 1) // m * m


def _cdiv(a, b):
    return -(-a // b)


def _pick_batch_tile(batch):
    """Batch tile: multiple of 8 sublanes, <= ~10% padding waste, and >= 2
    grid tiles for large batches so the 'parallel' axis can shard across the
    two TensorCores on v7x.  Capped at 512 so double-buffered tiles stay well
    inside v5e's 16 MiB scoped-VMEM default and v7x's halved VMEM."""
    batch = max(batch, 1)
    if batch <= 128:
        return _round_up(batch, 8)
    for tb in (512, 256, 128):
        n = _cdiv(batch, tb)
        if n >= 2 and tb * n <= 1.1 * batch:
            return tb
    # Fallback: two roughly-even tiles rounded to a sublane multiple.
    return _round_up(_cdiv(batch, 2), 8)


def _d3qn_kernel(x_ref, w1_ref, b1_ref, w2_ref, b2_ref,
                 w3a_ref, b3a_ref, w3v_ref, b3v_ref,
                 q_ref, asum_ref, *, batch, split):
    f32 = jnp.float32
    bf16 = jnp.bfloat16
    tb = x_ref.shape[0]

    # hidden = ReLU((x @ wv + bv) @ wh + bh); wv/bv folded into W1/b1.
    # bf16 operands, f32 accumulation, f32 bias-add / ReLU.
    x = x_ref[...].astype(bf16)
    h = jnp.maximum(
        jnp.dot(x, w1_ref[...], preferred_element_type=f32) + b1_ref[...], 0.0)

    # Fused first layers of the advantage / value streams.
    h2 = jnp.maximum(
        jnp.dot(h.astype(bf16), w2_ref[...], preferred_element_type=f32)
        + b2_ref[...], 0.0)
    h2 = h2.astype(bf16)

    # Split head matmuls (never multiply through zero off-diagonal blocks).
    if split:                              # streams in separate 128-lane blocks
        ha, hv = h2[:, :split], h2[:, split:]
    else:                                  # both streams packed in one block
        ha = hv = h2
    adv = jnp.dot(ha, w3a_ref[...], preferred_element_type=f32) + b3a_ref[...]
    val = jnp.dot(hv, w3v_ref[...], preferred_element_type=f32) + b3v_ref[...]

    q_ref[...] = adv + val                 # global adv-mean subtracted outside

    # Per-tile partial sum of the advantage.  Padded action lanes are exactly
    # zero by construction; padded / out-of-bounds batch rows (ragged last
    # tile) are masked out so garbage never reaches the sum.
    row = lax.broadcasted_iota(jnp.int32, (tb, 1), 0) + pl.program_id(0) * tb
    psum = jnp.sum(jnp.where(row < batch, adv, 0.0))
    asum_ref[...] = jnp.full((8, 128), psum, f32)


@functools.partial(jax.jit, static_argnames=("n_actions",))
def d3qn_forward(x, prepared, *, n_actions):
    W1, B1, W2, B2, W3a, B3a, W3v, B3v = prepared
    x = x.astype(jnp.float32)
    B, S = x.shape
    H_pad = W1.shape[1]
    HS = W2.shape[1]
    A_pad = W3a.shape[1]
    rows3 = W3a.shape[0]
    split = 0 if rows3 == HS else rows3    # 0 => packed single-block streams

    TB = _pick_batch_tile(B)
    n_tiles = _cdiv(B, TB)
    B_pad = n_tiles * TB

    resident = lambda i: (0, 0)
    tiled = lambda i: (i, 0)

    flops = 2 * B_pad * (S * H_pad + H_pad * HS + 2 * rows3 * A_pad)
    bytes_accessed = (
        4 * B * S                                              # x (f32, unpadded)
        + 2 * (S * H_pad + H_pad * HS + 2 * rows3 * A_pad)     # bf16 weights
        + 4 * (H_pad + HS + 2 * A_pad)                         # f32 biases
        + 4 * (B_pad * A_pad + n_tiles * 8 * 128))             # outputs

    kernel = functools.partial(_d3qn_kernel, batch=B, split=split)

    q_p, asum_p = pl.pallas_call(
        kernel,
        out_shape=(jax.ShapeDtypeStruct((B_pad, A_pad), jnp.float32),
                   jax.ShapeDtypeStruct((n_tiles * 8, 128), jnp.float32)),
        grid=(n_tiles,),
        in_specs=[
            pl.BlockSpec((TB, S), tiled),          # x at natural feature width
            pl.BlockSpec((S, H_pad), resident),    # W1  (bf16)
            pl.BlockSpec((1, H_pad), resident),    # b1  (f32)
            pl.BlockSpec((H_pad, HS), resident),   # W2  (bf16)
            pl.BlockSpec((1, HS), resident),       # b2  (f32)
            pl.BlockSpec((rows3, A_pad), resident),  # W3 advantage head (bf16)
            pl.BlockSpec((1, A_pad), resident),      # b3 advantage head
            pl.BlockSpec((rows3, A_pad), resident),  # W3 value head, replicated
            pl.BlockSpec((1, A_pad), resident),      # b3 value head, replicated
        ],
        out_specs=(pl.BlockSpec((TB, A_pad), tiled),
                   pl.BlockSpec((8, 128), tiled)),
        compiler_params=pltpu.CompilerParams(
            dimension_semantics=("parallel",)),
        cost_estimate=pl.CostEstimate(
            flops=flops, transcendentals=0, bytes_accessed=bytes_accessed),
    )(x, W1, B1, W2, B2, W3a, B3a, W3v, B3v)

    # Dueling combine with the GLOBAL advantage mean (over batch AND actions),
    # finished in XLA from exact per-tile partial sums (padding never pollutes
    # it).  Only the unpadded Q slice is returned.
    adv_mean = jnp.sum(asum_p[::8, 0]) / (B * n_actions)
    return q_p[:B, :n_actions] - adv_mean


def prepare_params(params, n_states, n_actions, hidden_dim, lane=128):
    """Fold/fuse/pad raw (in,out)-layout params; weights -> bf16, biases f32."""
    (wq, bq, wk, bk, wv, bv, wh, bh,
     wa1, ba1, wa2, ba2, wv1, bv1, wv2, bv2) = params
    del wq, bq, wk, bk          # attention over a length-1 sequence never uses q/k

    H_pad = _round_up(hidden_dim, lane)
    A_pad = _round_up(n_actions, lane)
    packed = hidden_dim <= lane // 2      # pack both streams in one 128-lane block

    # Layer 1: fold the value projection into the hidden layer (f32 fold,
    # then cast to bf16 -> a single rounding).
    w1 = wv @ wh                          # (S, hidden)
    b1 = bv @ wh + bh                     # (1, hidden)
    W1 = jnp.zeros((n_states, H_pad), jnp.float32).at[:, :hidden_dim].set(w1)
    B1 = jnp.zeros((1, H_pad), jnp.float32).at[:, :hidden_dim].set(b1)

    if packed:
        HS = lane                         # a1 in lanes [0:h), v1 in [64:64+h)
        v_base, w3_rows, v3_base = lane // 2, lane, lane // 2
    else:
        HS = 2 * H_pad                    # a1 block | v1 block
        v_base, w3_rows, v3_base = H_pad, H_pad, 0

    W2 = jnp.zeros((H_pad, HS), jnp.float32)
    W2 = W2.at[:hidden_dim, :hidden_dim].set(wa1)
    W2 = W2.at[:hidden_dim, v_base:v_base + hidden_dim].set(wv1)
    B2 = jnp.zeros((1, HS), jnp.float32)
    B2 = B2.at[:, :hidden_dim].set(ba1)
    B2 = B2.at[:, v_base:v_base + hidden_dim].set(bv1)

    # Advantage head (padded action lanes are exactly zero).
    W3a = jnp.zeros((w3_rows, A_pad), jnp.float32)
    W3a = W3a.at[:hidden_dim, :n_actions].set(wa2)
    B3a = jnp.zeros((1, A_pad), jnp.float32).at[:, :n_actions].set(ba2)

    # Value head replicated across A_pad lanes -> no cross-lane broadcast.
    W3v = jnp.zeros((w3_rows, A_pad), jnp.float32)
    W3v = W3v.at[v3_base:v3_base + hidden_dim, :].set(jnp.tile(wv2, (1, A_pad)))
    B3v = jnp.tile(bv2, (1, A_pad)).astype(jnp.float32)

    bf16 = jnp.bfloat16
    return (W1.astype(bf16), B1, W2.astype(bf16), B2,
            W3a.astype(bf16), B3a, W3v.astype(bf16), B3v)


def init_params(key, n_states, n_actions, hidden_dim):
    """Deterministic synthetic parameters. Weights are (in, out); biases (1, out)."""
    def linear(k, fan_in, fan_out):
        kw, kb = jax.random.split(k)
        bound = 1.0 / jnp.sqrt(jnp.float32(fan_in))
        w = jax.random.uniform(kw, (fan_in, fan_out), jnp.float32, -bound, bound)
        b = jax.random.uniform(kb, (1, fan_out), jnp.float32, -bound, bound)
        return w, b

    keys = jax.random.split(key, 8)
    wq, bq = linear(keys[0], n_states, n_states)
    wk, bk = linear(keys[1], n_states, n_states)
    wv, bv = linear(keys[2], n_states, n_states)
    wh, bh = linear(keys[3], n_states, hidden_dim)
    wa1, ba1 = linear(keys[4], hidden_dim, hidden_dim)
    wa2, ba2 = linear(keys[5], hidden_dim, n_actions)
    wv1, bv1 = linear(keys[6], hidden_dim, hidden_dim)
    wv2, bv2 = linear(keys[7], hidden_dim, 1)
    return (wq, bq, wk, bk, wv, bv, wh, bh,
            wa1, ba1, wa2, ba2, wv1, bv1, wv2, bv2)


def reference_forward(x, params):
    """Pure-JAX f32 reference mirroring the PyTorch module exactly."""
    (wq, bq, wk, bk, wv, bv, wh, bh,
     wa1, ba1, wa2, ba2, wv1, bv1, wv2, bv2) = params
    xs = x[:, None, :]                                 # (B, 1, S)
    q = xs @ wq + bq
    k = xs @ wk + bk
    v = xs @ wv + bv
    attn = jax.nn.softmax(q @ jnp.swapaxes(k, 1, 2), axis=-1)
    attended = attn @ v                                # (B, 1, S)
    xm = attended.mean(axis=1)                         # (B, S)
    h = jax.nn.relu(xm @ wh + bh)
    adv = jax.nn.relu(h @ wa1 + ba1) @ wa2 + ba2
    val = jax.nn.relu(h @ wv1 + bv1) @ wv2 + bv2
    return val + adv - adv.mean()


if __name__ == "__main__":
    B, n_states, n_actions, hidden_dim = 2, 16, 4, 32

    key = jax.random.PRNGKey(0)
    kx, kp = jax.random.split(key)
    x = jax.random.normal(kx, (B, n_states), dtype=jnp.float32)
    raw_params = init_params(kp, n_states, n_actions, hidden_dim)
    prepared = prepare_params(raw_params, n_states, n_actions, hidden_dim)

    out = d3qn_forward(x, prepared, n_actions=n_actions)
    out = jax.block_until_ready(out)

    ref = reference_forward(x, raw_params)
    assert out.shape == (B, n_actions)
    # bf16 weights (f32 accumulation) -> loosened tolerance per review.
    assert jnp.allclose(out, ref, atol=5e-2, rtol=5e-2), (out, ref)

    print("KERNEL_OK")
</pallas_src>

<mosaic_0001>
module attributes {stable_mosaic.version = 11 : i64} {
  func.func @_d3qn_kernel(%arg0: i32, %arg1: memref<8x16xf32, #tpu.memory_space<vmem>>, %arg2: memref<16x128xbf16, #tpu.memory_space<vmem>>, %arg3: memref<1x128xf32, #tpu.memory_space<vmem>>, %arg4: memref<128x128xbf16, #tpu.memory_space<vmem>>, %arg5: memref<1x128xf32, #tpu.memory_space<vmem>>, %arg6: memref<128x128xbf16, #tpu.memory_space<vmem>>, %arg7: memref<1x128xf32, #tpu.memory_space<vmem>>, %arg8: memref<128x128xbf16, #tpu.memory_space<vmem>>, %arg9: memref<1x128xf32, #tpu.memory_space<vmem>>, %arg10: memref<8x128xf32, #tpu.memory_space<vmem>>, %arg11: memref<8x128xf32, #tpu.memory_space<vmem>>) attributes {dimension_semantics = [#tpu.dimension_semantics<parallel>], iteration_bounds = array<i64: 1>, scalar_prefetch = 0 : i64, scratch_operands = 0 : i64, tpu.core_type = #tpu.core_type<tc>, window_params = [{transform_indices = @transform_0, window_bounds = array<i64: 8, 16>}, {pipeline_mode = #tpu.pipeline_mode<synchronous>, transform_indices = @transform_1, window_bounds = array<i64: 16, 128>}, {pipeline_mode = #tpu.pipeline_mode<synchronous>, transform_indices = @transform_2, window_bounds = array<i64: 1, 128>}, {pipeline_mode = #tpu.pipeline_mode<synchronous>, transform_indices = @transform_3, window_bounds = array<i64: 128, 128>}, {pipeline_mode = #tpu.pipeline_mode<synchronous>, transform_indices = @transform_4, window_bounds = array<i64: 1, 128>}, {pipeline_mode = #tpu.pipeline_mode<synchronous>, transform_indices = @transform_5, window_bounds = array<i64: 128, 128>}, {pipeline_mode = #tpu.pipeline_mode<synchronous>, transform_indices = @transform_6, window_bounds = array<i64: 1, 128>}, {pipeline_mode = #tpu.pipeline_mode<synchronous>, transform_indices = @transform_7, window_bounds = array<i64: 128, 128>}, {pipeline_mode = #tpu.pipeline_mode<synchronous>, transform_indices = @transform_8, window_bounds = array<i64: 1, 128>}, {transform_indices = @transform_9, window_bounds = array<i64: 8, 128>}, {transform_indices = @transform_10, window_bounds = array<i64: 8, 128>}]} {
    %c0 = arith.constant 0 : index
    %c0_0 = arith.constant 0 : index
    %0 = vector.load %arg1[%c0, %c0_0] : memref<8x16xf32, #tpu.memory_space<vmem>>, vector<8x16xf32>
    %1 = arith.truncf %0 : vector<8x16xf32> to vector<8x16xbf16>
    %c0_1 = arith.constant 0 : index
    %c0_2 = arith.constant 0 : index
    %2 = vector.load %arg2[%c0_1, %c0_2] : memref<16x128xbf16, #tpu.memory_space<vmem>>, vector<16x128xbf16>
    %cst = arith.constant dense<0.000000e+00> : vector<8x128xf32>
    %3 = tpu.matmul %1, %2, %cst {dimension_numbers = #tpu.dot_dimension_numbers<[1], [0], [0], [1], [0, 0, 1, 1], [], []>} : vector<8x16xbf16>, vector<16x128xbf16>, vector<8x128xf32> -> vector<8x128xf32>
    %c0_3 = arith.constant 0 : index
    %c0_4 = arith.constant 0 : index
    %4 = vector.load %arg3[%c0_3, %c0_4] : memref<1x128xf32, #tpu.memory_space<vmem>>, vector<1x128xf32>
    %5 = vector.broadcast %4 : vector<1x128xf32> to vector<8x128xf32>
    %6 = arith.addf %3, %5 : vector<8x128xf32>
    %cst_5 = arith.constant 0.000000e+00 : f32
    %7 = vector.broadcast %cst_5 : f32 to vector<8x128xf32>
    %8 = arith.maximumf %6, %7 : vector<8x128xf32>
    %9 = arith.truncf %8 : vector<8x128xf32> to vector<8x128xbf16>
    %c0_6 = arith.constant 0 : index
    %c0_7 = arith.constant 0 : index
    %10 = vector.load %arg4[%c0_6, %c0_7] : memref<128x128xbf16, #tpu.memory_space<vmem>>, vector<128x128xbf16>
    %cst_8 = arith.constant dense<0.000000e+00> : vector<8x128xf32>
    %11 = tpu.matmul %9, %10, %cst_8 {dimension_numbers = #tpu.dot_dimension_numbers<[1], [0], [0], [1], [0, 0, 1, 1], [], []>} : vector<8x128xbf16>, vector<128x128xbf16>, vector<8x128xf32> -> vector<8x128xf32>
    %c0_9 = arith.constant 0 : index
    %c0_10 = arith.constant 0 : index
    %12 = vector.load %arg5[%c0_9, %c0_10] : memref<1x128xf32, #tpu.memory_space<vmem>>, vector<1x128xf32>
    %13 = vector.broadcast %12 : vector<1x128xf32> to vector<8x128xf32>
    %14 = arith.addf %11, %13 : vector<8x128xf32>
    %cst_11 = arith.constant 0.000000e+00 : f32
    %15 = vector.broadcast %cst_11 : f32 to vector<8x128xf32>
    %16 = arith.maximumf %14, %15 : vector<8x128xf32>
    %17 = arith.truncf %16 : vector<8x128xf32> to vector<8x128xbf16>
    %c0_12 = arith.constant 0 : index
    %c0_13 = arith.constant 0 : index
    %18 = vector.load %arg6[%c0_12, %c0_13] : memref<128x128xbf16, #tpu.memory_space<vmem>>, vector<128x128xbf16>
    %cst_14 = arith.constant dense<0.000000e+00> : vector<8x128xf32>
    %19 = tpu.matmul %17, %18, %cst_14 {dimension_numbers = #tpu.dot_dimension_numbers<[1], [0], [0], [1], [0, 0, 1, 1], [], []>} : vector<8x128xbf16>, vector<128x128xbf16>, vector<8x128xf32> -> vector<8x128xf32>
    %c0_15 = arith.constant 0 : index
    %c0_16 = arith.constant 0 : index
    %20 = vector.load %arg7[%c0_15, %c0_16] : memref<1x128xf32, #tpu.memory_space<vmem>>, vector<1x128xf32>
    %21 = vector.broadcast %20 : vector<1x128xf32> to vector<8x128xf32>
    %22 = arith.addf %19, %21 : vector<8x128xf32>
    %c0_17 = arith.constant 0 : index
    %c0_18 = arith.constant 0 : index
    %23 = vector.load %arg8[%c0_17, %c0_18] : memref<128x128xbf16, #tpu.memory_space<vmem>>, vector<128x128xbf16>
    %cst_19 = arith.constant dense<0.000000e+00> : vector<8x128xf32>
    %24 = tpu.matmul %17, %23, %cst_19 {dimension_numbers = #tpu.dot_dimension_numbers<[1], [0], [0], [1], [0, 0, 1, 1], [], []>} : vector<8x128xbf16>, vector<128x128xbf16>, vector<8x128xf32> -> vector<8x128xf32>
    %c0_20 = arith.constant 0 : index
    %c0_21 = arith.constant 0 : index
    %25 = vector.load %arg9[%c0_20, %c0_21] : memref<1x128xf32, #tpu.memory_space<vmem>>, vector<1x128xf32>
    %26 = vector.broadcast %25 : vector<1x128xf32> to vector<8x128xf32>
    %27 = arith.addf %24, %26 : vector<8x128xf32>
    %28 = arith.addf %22, %27 : vector<8x128xf32>
    %c0_22 = arith.constant 0 : index
    %c0_23 = arith.constant 0 : index
    %29 = vector.load %arg10[%c0_22, %c0_23] : memref<8x128xf32, #tpu.memory_space<vmem>>, vector<8x128xf32>
    tpu.vector_store %arg10[%c0_22, %c0_23], %28 {strides = array<i32>} : memref<8x128xf32, #tpu.memory_space<vmem>>, vector<8x128xf32>,
    %30 = tpu.iota {dimensions = array<i32: 0>} : vector<8x1xi32>
    %c8_i32 = arith.constant 8 : i32
    %31 = arith.muli %arg0, %c8_i32 : i32
    %32 = vector.broadcast %31 : i32 to vector<8x1xi32>
    %33 = arith.addi %30, %32 : vector<8x1xi32>
    %c2_i32 = arith.constant 2 : i32
    %34 = vector.broadcast %c2_i32 : i32 to vector<8x1xi32>
    %35 = arith.cmpi slt, %33, %34 : vector<8x1xi32>
    %cst_24 = arith.constant 0.000000e+00 : f32
    %36 = vector.shape_cast %35 : vector<8x1xi1> to vector<8x1xi1>
    %37 = vector.broadcast %36 : vector<8x1xi1> to vector<8x128xi1>
    %38 = vector.broadcast %cst_24 : f32 to vector<8x128xf32>
    %39 = arith.select %37, %22, %38 : vector<8x128xi1>, vector<8x128xf32>
    %40 = vector.shape_cast %39 : vector<8x128xf32> to vector<1x8x128xf32>
    %cst_25 = arith.constant dense<0.000000e+00> : vector<1xf32>
    %41 = vector.multi_reduction <add>, %40, %cst_25 [1, 2] : vector<1x8x128xf32> to vector<1xf32>
    %42 = vector.shape_cast %41 : vector<1xf32> to vector<1x1x1xf32>
    %43 = vector.extract %42[0, 0, 0] : f32 from vector<1x1x1xf32>
    %44 = vector.broadcast %43 : f32 to vector<8x128xf32>
    %c0_26 = arith.constant 0 : index
    %c0_27 = arith.constant 0 : index
    %45 = vector.load %arg11[%c0_26, %c0_27] : memref<8x128xf32, #tpu.memory_space<vmem>>, vector<8x128xf32>
    tpu.vector_store %arg11[%c0_26, %c0_27], %44 {strides = array<i32>} : memref<8x128xf32, #tpu.memory_space<vmem>>, vector<8x128xf32>,
    return
  }
  func.func @transform_0(%arg0: i32) -> (i32, i32) {
    %c0_i32 = arith.constant 0 : i32
    %c0_i32_0 = arith.constant 0 : i32
    return %arg0, %c0_i32 : i32, i32
  }
  func.func @transform_1(%arg0: i32) -> (i32, i32) {
    %c0_i32 = arith.constant 0 : i32
    %c0_i32_0 = arith.constant 0 : i32
    %c0_i32_1 = arith.constant 0 : i32
    return %c0_i32, %c0_i32_0 : i32, i32
  }
  func.func @transform_2(%arg0: i32) -> (i32, i32) {
    %c0_i32 = arith.constant 0 : i32
    %c0_i32_0 = arith.constant 0 : i32
    %c0_i32_1 = arith.constant 0 : i32
    return %c0_i32, %c0_i32_0 : i32, i32
  }
  func.func @transform_3(%arg0: i32) -> (i32, i32) {
    %c0_i32 = arith.constant 0 : i32
    %c0_i32_0 = arith.constant 0 : i32
    %c0_i32_1 = arith.constant 0 : i32
    return %c0_i32, %c0_i32_0 : i32, i32
  }
  func.func @transform_4(%arg0: i32) -> (i32, i32) {
    %c0_i32 = arith.constant 0 : i32
    %c0_i32_0 = arith.constant 0 : i32
    %c0_i32_1 = arith.constant 0 : i32
    return %c0_i32, %c0_i32_0 : i32, i32
  }
  func.func @transform_5(%arg0: i32) -> (i32, i32) {
    %c0_i32 = arith.constant 0 : i32
    %c0_i32_0 = arith.constant 0 : i32
    %c0_i32_1 = arith.constant 0 : i32
    return %c0_i32, %c0_i32_0 : i32, i32
  }
  func.func @transform_6(%arg0: i32) -> (i32, i32) {
    %c0_i32 = arith.constant 0 : i32
    %c0_i32_0 = arith.constant 0 : i32
    %c0_i32_1 = arith.constant 0 : i32
    return %c0_i32, %c0_i32_0 : i32, i32
  }
  func.func @transform_7(%arg0: i32) -> (i32, i32) {
    %c0_i32 = arith.constant 0 : i32
    %c0_i32_0 = arith.constant 0 : i32
    %c0_i32_1 = arith.constant 0 : i32
    return %c0_i32, %c0_i32_0 : i32, i32
  }
  func.func @transform_8(%arg0: i32) -> (i32, i32) {
    %c0_i32 = arith.constant 0 : i32
    %c0_i32_0 = arith.constant 0 : i32
    %c0_i32_1 = arith.constant 0 : i32
    return %c0_i32, %c0_i32_0 : i32, i32
  }
  func.func @transform_9(%arg0: i32) -> (i32, i32) {
    %c0_i32 = arith.constant 0 : i32
    %c0_i32_0 = arith.constant 0 : i32
    return %arg0, %c0_i32 : i32, i32
  }
  func.func @transform_10(%arg0: i32) -> (i32, i32) {
    %c0_i32 = arith.constant 0 : i32
    %c0_i32_0 = arith.constant 0 : i32
    return %arg0, %c0_i32 : i32, i32
  }
}

</mosaic_0001>

<bundles_post_ra>
// kernel: d3qn_forward.1
= control target key start
LH: loop header
LB: loop body
LE: loop exit
PB: predicated region body
PF: predicated region fallthrough
CT: control target
= control target key end

     0   :  { %16 = vsyncpa [#allocation3], 0  ;;  %s954_s0 = inlined_call_operand.vmem [shape: f32[2,16], index: 0, kind: input, shape index: {}]   ;;  %s955_s1 = inlined_call_operand.vmem [shape: bf16[16,128], index: 1, kind: input, shape index: {}]   ;;  %s956_s2 = inlined_call_operand.vmem [shape: f32[1,128], index: 2, kind: input, shape index: {}]   ;;  %s957_s3 = inlined_call_operand.hbm [shape: bf16[128,128], index: 3, kind: input, shape index: {}]   ;;  %s958_s4 = inlined_call_operand.vmem [shape: f32[1,128], index: 4, kind: input, shape index: {}]   ;;  %s959_s5 = inlined_call_operand.hbm [shape: bf16[128,128], index: 5, kind: input, shape index: {}]   ;;  %s960_s6 = inlined_call_operand.vmem [shape: f32[1,128], index: 6, kind: input, shape index: {}]   ;;  %s961_s7 = inlined_call_operand.hbm [shape: bf16[128,128], index: 7, kind: input, shape index: {}]   ;;  %s962_s8 = inlined_call_operand.hbm [shape: f32[1,128], index: 8, kind: input, shape index: {}]   ;;  %s963_s9 = inlined_call_operand.vmem [shape: f32[8,128], index: 9, kind: output, shape index: {0}]   ;;  %s964_s10 = inlined_call_operand.vmem [shape: f32[8,128], index: 10, kind: output, shape index: {1}]  }
   0x1   :  { %17 = vsyncpa [#allocation5], 0 }
   0x2   :  { %18 = vsyncpa [#allocation8], 0  ;;  %s773_s13 = smov [#allocation4]   ;;  %s774_s15 = smov [#allocation2]  }
   0x3   :  { %s44_s14 = sshll.u32 %s773_s13, 4  ;;  %s30_s16 = sshll.u32 %s774_s15, 4  ;;  %s45_s14 = int_to_ptr.vmem [resolvable:$true] %s44_s14  ;;  %s836_s16 = int_to_ptr.vmem [resolvable:$true] %s30_s16 }
   0x4   :  { %s679_s19 = scalar_lea.hbm %s959_s5, 1024 }
   0x5   :  { %p680_p0 = scmp.ne.s32.totalorder %s959_s5, %s679_s19  ;;  %p683_p1 = scmp.lt.u32.totalorder %s679_s19, %s959_s5 }
   0x7   :  { %p685_p2 = pnand %p683_p1, %p680_p0 }
   0x9   :  { %688 = shalt.err (!%p685_p2)
}
   0xa   :  { %s689_s24 = scalar_lea.vmem %s45_s14, 1024  ;;  %p694_p4 = scmp.lt.s32.totalorder %s45_s14, %s45_s14 }
   0xb   :  { %p690_p3 = scmp.ne.s32.totalorder %s45_s14, %s689_s24  ;;  %p695_p5 = scmp.lt.s32.totalorder %s689_s24, %s689_s24 }
   0xd   :  { %p696_p6 = por %p695_p5, %p694_p4 }
   0xf   :  { %p697_p7 = pnand %p696_p6, %p690_p3 }
  0x11   :  { %700 = shalt.err (!%p697_p7)
}
  0x12   :  { %s775_s25 = smov 64   ;;  %s776_s26 = smov 4  }
  0x13   :  { %50 = dma.hbm_to_vmem [thread:$0]  %s959_s5, 1024, %s45_s14, [#allocation5], %s775_s25, %s775_s25, %s776_s26  }
  0x14   :  { %s701_s11 = scalar_lea.hbm %s957_s3, 1024 }
  0x15   :  { %p702_p8 = scmp.ne.s32.totalorder %s957_s3, %s701_s11  ;;  %p705_p9 = scmp.lt.u32.totalorder %s701_s11, %s957_s3 }
  0x17   :  { %p707_p10 = pnand %p705_p9, %p702_p8 }
  0x19   :  { %710 = shalt.err (!%p707_p10)
}
  0x1a   :  { %s711_s18 = scalar_lea.vmem %s836_s16, 1024  ;;  %p716_p12 = scmp.lt.s32.totalorder %s836_s16, %s836_s16 }
  0x1b   :  { %p712_p11 = scmp.ne.s32.totalorder %s836_s16, %s711_s18  ;;  %p717_p13 = scmp.lt.s32.totalorder %s711_s18, %s711_s18 }
  0x1d   :  { %p718_p0 = por %p717_p13, %p716_p12 }
  0x1f   :  { %p719_p1 = pnand %p718_p0, %p712_p11 }
  0x21   :  { %722 = shalt.err (!%p719_p1)
}
  0x22   :  { %36 = dma.hbm_to_vmem [thread:$0]  %s957_s3, 1024, %s836_s16, [#allocation3], %s775_s25, %s775_s25, %s776_s26  }
  0x23   :  { %s777_s19 = smov [#allocation6]   ;;  %s778_s21 = smov [#allocation7]  }
  0x24   :  { %s58_s20 = sshll.u32 %s777_s19, 4  ;;  %s71_s22 = sshll.u32 %s778_s21, 4  ;;  %s59_s20 = int_to_ptr.vmem [resolvable:$true] %s58_s20  ;;  %s72_s22 = int_to_ptr.vmem [resolvable:$true] %s71_s22 }
  0x25   :  { %s723_s27 = scalar_lea.hbm %s961_s7, 1024 }
  0x26   :  { %p724_p2 = scmp.ne.s32.totalorder %s961_s7, %s723_s27  ;;  %p727_p3 = scmp.lt.u32.totalorder %s723_s27, %s961_s7 }
  0x28   :  { %p729_p4 = pnand %p727_p3, %p724_p2 }
  0x2a   :  { %732 = shalt.err (!%p729_p4)
}
  0x2b   :  { %s733_s3 = scalar_lea.vmem %s59_s20, 1024  ;;  %p738_p6 = scmp.lt.s32.totalorder %s59_s20, %s59_s20 }
  0x2c   :  { %p734_p5 = scmp.ne.s32.totalorder %s59_s20, %s733_s3  ;;  %p739_p7 = scmp.lt.s32.totalorder %s733_s3, %s733_s3 }
  0x2e   :  { %p740_p8 = por %p739_p7, %p738_p6 }
  0x30   :  { %p741_p9 = pnand %p740_p8, %p734_p5 }
  0x32   :  { %744 = shalt.err (!%p741_p9)
}
  0x33   :  { %64 = dma.hbm_to_vmem [thread:$0]  %s961_s7, 1024, %s59_s20, [#allocation5], %s775_s25, %s775_s25, %s776_s26  }
  0x34   :  { %s745_s17 = scalar_lea.hbm %s962_s8, 16 }
  0x35   :  { %p746_p10 = scmp.ne.s32.totalorder %s962_s8, %s745_s17  ;;  %p749_p11 = scmp.lt.u32.totalorder %s745_s17, %s962_s8 }
  0x37   :  { %p751_p12 = pnand %p749_p11, %p746_p10 }
  0x39   :  { %754 = shalt.err (!%p751_p12)
}
  0x3a   :  { %s755_s21 = scalar_lea.vmem %s72_s22, 16  ;;  %s759_s23 = scalar_lea.vmem %s72_s22, 32 }
  0x3b   :  { %p756_p13 = scmp.ne.s32.totalorder %s72_s22, %s755_s21  ;;  %p760_p0 = scmp.lt.s32.totalorder %s72_s22, %s72_s22 }
  0x3c   :  { %p761_p1 = scmp.lt.s32.totalorder %s759_s23, %s755_s21 }
  0x3e   :  { %p762_p2 = por %p761_p1, %p760_p0 }
  0x40   :  { %p763_p3 = pnand %p762_p2, %p756_p13 }
  0x42   :  { %766 = shalt.err (!%p763_p3)
}
  0x43   :  { %74 = dma.hbm_to_vmem [thread:$0]  %s962_s8, 16, %s72_s22, [#allocation8]  }
  0x44   :  { %767 = dma.done.wait [#allocation3], 1024  }
  0x45   :  { %768 = vsyncadd [#allocation3], 4294966272 }
  0x46   :  { %769 = dma.done.wait [#allocation5], 2048  }
  0x47   :  { %770 = vsyncadd [#allocation5], 4294965248 }
  0x48   :  { %771 = dma.done.wait [#allocation8], 16  }
  0x49   :  { %772 = vsyncadd [#allocation8], 4294967280  ;;  %v779_v0 = vmov 0.0   ;;  %vm780_vm0 = vmmov 0   ;;  %v654_v1 = vld [vmem:[%s955_s1] sm:$0xff]   ;;  %vm105_vm1 = vcmask 130048   ;;  %v488_v44 = vlaneseq }
  0x4a   :  { %578 = vmatprep.subr.bf16.mxu0 %v779_v0  ;;  %580 = vmatprep.mubr.msk.bf16.mxu0 %vm780_vm0, %v779_v0  ;;  %v88_v2 = vld [vmem:[%s954_s0] sm:$0xff]  ;;  %v655_v4 = vld [vmem:[#allocation2] sm:$0xff]   ;;  %v656_v5 = vld [vmem:[#allocation2 + $0x8] sm:$0xff]  }
  0x4b   :  { %584 = vmatprep.subr.bf16.mxu1 %v779_v0  ;;  %600 = vmatprep.mubr.msk.bf16.mxu1 %vm780_vm0, %v779_v0  ;;  %v89_v3 = vpack.c.bf16 %v88_v2, %v88_v2  ;;  %v657_v6 = vld [vmem:[#allocation2 + $0x10] sm:$0xff]   ;;  %v658_v7 = vld [vmem:[#allocation2 + $0x18] sm:$0xff]   ;;  %v659_v8 = vld [vmem:[#allocation2 + $0x20] sm:$0xff]   ;;  %v489_v45 = vshrl.u32 %v488_v44, 7 }
  0x4c   :  { %579 = vmatpush3.bf16.msra.mxu0 %v654_v1  ;;  %585 = vmatpush3.bf16.msra.mxu1 %v655_v4  ;;  %v660_v9 = vld [vmem:[#allocation2 + $0x28] sm:$0xff]   ;;  %v661_v10 = vld [vmem:[#allocation2 + $0x30] sm:$0xff]   ;;  %v662_v11 = vld [vmem:[#allocation2 + $0x38] sm:$0xff]  }
  0x4d   :  { %604 = vmatprep.subr.bf16.mxu0 %v779_v0  ;;  %586 = vmatprep.subr.bf16.mxu1 %v779_v0  ;;  %v663_v12 = vld [vmem:[#allocation4] sm:$0xff]   ;;  %v665_v13 = vld [vmem:[#allocation4 + $0x8] sm:$0xff]   ;;  %v667_v14 = vld [vmem:[#allocation4 + $0x10] sm:$0xff]   ;;  %vm493_vm2 = vcmp.lt.s32.totalorder %v489_v45, 2 }
  0x4e   :  { %v669_v15 = vld [vmem:[#allocation4 + $0x18] sm:$0xff]   ;;  %v671_v16 = vld [vmem:[#allocation4 + $0x20] sm:$0xff]   ;;  %v673_v17 = vld [vmem:[#allocation4 + $0x28] sm:$0xff]  }
  0x4f   :  { %581 = vmatmul.mubr.msk.bf16.vlgmr.msra.gmra.mrb[0].mxu0 %vm105_vm1, %v89_v3  ;;  %v519_v18 = vld [vmem:[%s956_s2] ss:$0 sm:$0xff]  ;;  %v664_v25 = vld [vmem:[#allocation6] sm:$0xff]   ;;  %v666_v27 = vld [vmem:[#allocation6 + $0x8] sm:$0xff]  }
  0x50   :  { %620 = vmatprep.mubr.msk.bf16.mxu0 %vm780_vm0, %v779_v0  ;;  %587 = vmatpush3.bf16.msra.mxu1 %v656_v5  ;;  %v668_v28 = vld [vmem:[#allocation6 + $0x10] sm:$0xff]   ;;  %v670_v29 = vld [vmem:[#allocation6 + $0x18] sm:$0xff]   ;;  %v672_v30 = vld [vmem:[#allocation6 + $0x20] sm:$0xff]  }
  0x51   :  { %588 = vmatprep.subr.bf16.mxu1 %v779_v0  ;;  %605 = vmatpush3.bf16.msra.mxu0 %v663_v12  ;;  %v674_v31 = vld [vmem:[#allocation6 + $0x28] sm:$0xff]   ;;  %v675_v32 = vld [vmem:[#allocation4 + $0x30] sm:$0xff]   ;;  %v677_v34 = vld [vmem:[#allocation4 + $0x38] sm:$0xff]  }
  0x52   :  { %606 = vmatprep.subr.bf16.mxu0 %v779_v0  ;;  %v676_v33 = vld [vmem:[#allocation6 + $0x30] sm:$0xff]   ;;  %v678_v35 = vld [vmem:[#allocation6 + $0x38] sm:$0xff]   ;;  %v540_v47 = vld [vmem:[#allocation7] ss:$0 sm:$0xff] }
  0x53   :  { %v522_v36 = vld [vmem:[%s958_s4] ss:$0 sm:$0xff] }
  0x54   :  { %589 = vmatpush3.bf16.msra.mxu1 %v657_v6  ;;  %v531_v46 = vld [vmem:[%s960_s6] ss:$0 sm:$0xff] }
  0x55   :  { %590 = vmatprep.subr.bf16.mxu1 %v779_v0  ;;  %607 = vmatpush3.bf16.msra.mxu0 %v665_v13 }
  0x56   :  { %608 = vmatprep.subr.bf16.mxu0 %v779_v0 }
  0x58   :  { %591 = vmatpush3.bf16.msra.mxu1 %v658_v7 }
  0x59   :  { %592 = vmatprep.subr.bf16.mxu1 %v779_v0  ;;  %609 = vmatpush3.bf16.msra.mxu0 %v667_v14 }
  0x5a   :  { %610 = vmatprep.subr.bf16.mxu0 %v779_v0 }
  0x5c   :  { %593 = vmatpush3.bf16.msra.mxu1 %v659_v8 }
  0x5d   :  { %594 = vmatprep.subr.bf16.mxu1 %v779_v0  ;;  %611 = vmatpush3.bf16.msra.mxu0 %v669_v15 }
  0x5e   :  { %612 = vmatprep.subr.bf16.mxu0 %v779_v0 }
  0x60   :  { %595 = vmatpush3.bf16.msra.mxu1 %v660_v9 }
  0x61   :  { %596 = vmatprep.subr.bf16.mxu1 %v779_v0  ;;  %613 = vmatpush3.bf16.msra.mxu0 %v671_v16 }
  0x62   :  { %614 = vmatprep.subr.bf16.mxu0 %v779_v0 }
  0x64   :  { %597 = vmatpush3.bf16.msra.mxu1 %v661_v10 }
  0x65   :  { %598 = vmatprep.subr.bf16.mxu1 %v779_v0  ;;  %615 = vmatpush3.bf16.msra.mxu0 %v673_v17 }
  0x66   :  { %616 = vmatprep.subr.bf16.mxu0 %v779_v0 }
  0x68   :  { %599 = vmatpush3.bf16.msra.mxu1 %v662_v11 }
  0x69   :  { %624 = vmatprep.subr.bf16.mxu1 %v779_v0  ;;  %617 = vmatpush3.bf16.msra.mxu0 %v675_v32 }
  0x6a   :  { %618 = vmatprep.subr.bf16.mxu0 %v779_v0 }
  0x6d   :  { %619 = vmatpush3.bf16.msra.mxu0 %v677_v34 }
 0x122   :  { %v143_v19 = vpop.f32.mrb[0].mxu0 }
 0x123   :  { %v144_v20 = vadd.f32 %v519_v18, %v143_v19  ;;  %v582_v21 = vpop.f32.mrb[1].mxu0 }
 0x124   :  { %v146_v22 = vpop.f32.mrb[2].mxu0 }
 0x125   :  { %v149_v23 = vmax.f32 %v144_v20, 0.0  ;;  %v583_v24 = vpop.f32.mrb[3].mxu0 }
 0x127   :  { %v150_v26 = vpack.c.bf16 %v149_v23, %v149_v23 }
 0x129   :  { %601 = vmatmul.mubr.bf16.vlgmr.msra.gmra.mrb[0].mxu1 %v150_v26 }
 0x12a   :  { %625 = vmatpush3.bf16.msra.mxu1 %v664_v25  ;;  %640 = vmatprep.mubr.msk.bf16.mxu1 %vm780_vm0, %v779_v0 }
 0x12b   :  { %626 = vmatprep.subr.bf16.mxu1 %v779_v0 }
 0x12e   :  { %627 = vmatpush3.bf16.msra.mxu1 %v666_v27 }
 0x12f   :  { %628 = vmatprep.subr.bf16.mxu1 %v779_v0 }
 0x132   :  { %629 = vmatpush3.bf16.msra.mxu1 %v668_v28 }
 0x133   :  { %630 = vmatprep.subr.bf16.mxu1 %v779_v0 }
 0x136   :  { %631 = vmatpush3.bf16.msra.mxu1 %v670_v29 }
 0x137   :  { %632 = vmatprep.subr.bf16.mxu1 %v779_v0 }
 0x13a   :  { %633 = vmatpush3.bf16.msra.mxu1 %v672_v30 }
 0x13b   :  { %634 = vmatprep.subr.bf16.mxu1 %v779_v0 }
 0x13e   :  { %635 = vmatpush3.bf16.msra.mxu1 %v674_v31 }
 0x13f   :  { %636 = vmatprep.subr.bf16.mxu1 %v779_v0 }
 0x142   :  { %637 = vmatpush3.bf16.msra.mxu1 %v676_v33 }
 0x143   :  { %638 = vmatprep.subr.bf16.mxu1 %v779_v0 }
 0x146   :  { %639 = vmatpush3.bf16.msra.mxu1 %v678_v35 }
 0x1fc   :  { %v256_v37 = vpop.f32.mrb[0].mxu1 }
 0x1fd   :  { %v257_v38 = vadd.f32 %v522_v36, %v256_v37  ;;  %v602_v39 = vpop.f32.mrb[1].mxu1 }
 0x1fe   :  { %v259_v40 = vpop.f32.mrb[2].mxu1 }
 0x1ff   :  { %v262_v41 = vmax.f32 %v257_v38, 0.0  ;;  %v603_v42 = vpop.f32.mrb[3].mxu1 }
 0x201   :  { %v263_v43 = vpack.c.bf16 %v262_v41, %v262_v41 }
 0x203   :  { %621 = vmatmul.mubr.bf16.vlgmr.msra.gmra.mrb[4].mxu0 %v263_v43  ;;  %641 = vmatmul.mubr.bf16.vlgmr.msra.gmra.mrb[4].mxu1 %v263_v43 }
 0x2d6   :  { %v369_v48 = vpop.f32.mrb[4].mxu0  ;;  %v480_v49 = vpop.f32.mrb[4].mxu1 }
 0x2d7   :  { %v370_v50 = vadd.f32 %v531_v46, %v369_v48  ;;  %v481_v51 = vadd.f32 %v540_v47, %v480_v49  ;;  %v622_v52 = vpop.f32.mrb[5].mxu0  ;;  %v642_v53 = vpop.f32.mrb[5].mxu1 }
 0x2d8   :  { %v372_v54 = vpop.f32.mrb[6].mxu0  ;;  %v483_v55 = vpop.f32.mrb[6].mxu1 }
 0x2d9   :  { %v486_v56 = vadd.f32 %v481_v51, %v370_v50  ;;  %v623_v57 = vpop.f32.mrb[7].mxu0  ;;  %v643_v58 = vpop.f32.mrb[7].mxu1  ;;  %v496_v59 = vsel %vm493_vm2, %v370_v50, 0.0 }
 0x2da   :  { %497 = vadd.xlane.f32.xlu0 %v496_v59 }
 0x2db   :  { %487 = vst [vmem:[%s963_s9] sm:$0xff] %v486_v56 }
 0x367   :  { %v498_v60 = vpop.xlane.xlu0 %497 }
 0x368   :  { %v499_v61 = vrot.slane %v498_v60, 4 }
 0x36a   :  { %v500_v62 = vadd.f32 %v499_v61, %v498_v60 }
 0x36c   :  { %v501_v63 = vrot.slane %v500_v62, 2 }
 0x36e   :  { %v502_v0 = vadd.f32 %v501_v63, %v500_v62 }
 0x370   :  { %v503_v1 = vrot.slane %v502_v0, 1 }
 0x372   :  { %v504_v2 = vadd.f32 %v503_v1, %v502_v0 }
 0x374   :  { %644 = vpush %v504_v2 }
 0x3a5   :  { %s645_s6 = spop %644 }
 0x3a6   :  { %v506_v3 = vstv %s645_s6 }
 0x3a7   :  { %507 = vst [vmem:[%s964_s10] sm:$0xff] %v506_v3 }
 0x3a8   :  { %516 = vsyncpa [#allocation3], 1 }
 0x3a9   :  { %517 = vsyncpa [#allocation5], 1 }
 0x3aa   :  { %518 = vsyncpa [#allocation8], 1 }

</bundles_post_ra>
